<compile_context>
chip_gen: v6e
topology: v6e:2x2x1
jax: 0.10.0
libtpu: 0.0.40
codegen_flags: <defaults>
</compile_context>

<pallas_src>
import jax
import jax.numpy as jnp
from jax.experimental import pallas as pl
from jax.experimental.pallas import tpu as pltpu

LANE = 128


def _round_up(x, m):
    return (x + m - 1) // m * m


def fused_feature_fc_kernel(patches_ref, wconv_ref, bconv_ref, ones_ref,
                            wfc_ref, bfc_ref, out_ref):
    """One grid step = one sample: conv-as-matmul + ReLU + sum-pool + fc."""
    # conv (im2col matmul), bf16 inputs, f32 accumulation on the MXU:
    # (HW, Kp) @ (Kp, Fp) -> (HW, Fp)
    feat = jnp.dot(patches_ref[...], wconv_ref[...],
                   preferred_element_type=jnp.float32)
    feat = jnp.maximum(feat + bconv_ref[...], 0.0)          # bias + ReLU (f32, VPU)

    # global pool as an MXU matmul: (1, HW) @ (HW, Fp) -> (1, Fp)
    # (the 1/HW of the average pool is pre-folded into wfc in the wrapper)
    pooled = jnp.dot(ones_ref[...], feat, preferred_element_type=jnp.float32)

    # fc: (1, Fp) @ (Fp, NCp) + bias -> (1, NCp); NCp = 128 -> lane-dense store
    logits = jnp.dot(pooled, wfc_ref[...],
                     preferred_element_type=jnp.float32) + bfc_ref[...]
    out_ref[...] = logits.reshape(out_ref.shape).astype(out_ref.dtype)


def im2col_nchw(x, k=3, pad=1):
    """(N, C, H, W) -> (N, H*W, C*k*k), flatten order (c, ky, kx) to match
    torch weight.reshape(F, C*k*k)."""
    N, C, H, W = x.shape
    x_pad = jnp.pad(x, ((0, 0), (0, 0), (pad, pad), (pad, pad)))
    patch_list = [x_pad[:, :, ky:ky + H, kx:kx + W]
                  for ky in range(k) for kx in range(k)]      # each (N, C, H, W)
    patches = jnp.stack(patch_list, axis=2)                   # (N, C, k*k, H, W)
    patches = patches.reshape(N, C * k * k, H * W)
    return jnp.transpose(patches, (0, 2, 1))                  # (N, H*W, C*k*k)


def network_forward(x_nchw, params):
    """Full forward pass. x_nchw: (N, C, H, W) float32."""
    w_conv = params["w_conv"]   # (F, C, 3, 3)
    b_conv = params["b_conv"]   # (F,)
    w_fc = params["w_fc"]       # (numclass, F)   -- torch nn.Linear layout
    b_fc = params["b_fc"]       # (numclass,)

    N, C, H, W = x_nchw.shape
    F = w_conv.shape[0]
    numclass = w_fc.shape[0]
    HW = H * W
    CK = C * 9
    M = N * HW

    Kp = _round_up(CK, LANE)          # pad K (=36) -> 128: unmasked lane loads
    Fp = _round_up(F, LANE)           # pad F (=32) -> 128
    NCp = _round_up(numclass, LANE)   # pad numclass (=10) -> 128: lane-dense store

    # TODO(synk): for large N/H/W, fold im2col into the kernel (9 shifted matmuls
    # from an NHWC VMEM block) to avoid the 9x HBM expansion of `patches`.
    patches = im2col_nchw(x_nchw).reshape(M, CK)
    patches = jnp.pad(patches, ((0, 0), (0, Kp - CK))).astype(jnp.bfloat16)

    wconv = jnp.pad(w_conv.reshape(F, CK).T,
                    ((0, Kp - CK), (0, Fp - F))).astype(jnp.bfloat16)
    bconv = jnp.pad(b_conv.reshape(1, F),
                    ((0, 0), (0, Fp - F))).astype(jnp.float32)

    # Fold 1/HW of the average pool into the fc weight (done once at trace time).
    wfc = jnp.pad(w_fc.T * (1.0 / HW),
                  ((0, Fp - F), (0, NCp - numclass))).astype(jnp.float32)
    bfc = jnp.pad(b_fc.reshape(1, numclass),
                  ((0, 0), (0, NCp - numclass))).astype(jnp.float32)

    ones_row = jnp.ones((1, HW), jnp.float32)

    flops = 2 * M * Kp * Fp + 2 * N * HW * Fp + 2 * N * Fp * NCp
    bytes_accessed = (patches.size * 2 + wconv.size * 2 + bconv.size * 4 +
                      ones_row.size * 4 + wfc.size * 4 + bfc.size * 4 +
                      N * NCp * 4)

    out = pl.pallas_call(
        fused_feature_fc_kernel,
        out_shape=jax.ShapeDtypeStruct((N, 1, NCp), jnp.float32),
        grid_spec=pl.GridSpec(
            grid=(N,),
            in_specs=[
                pl.BlockSpec((HW, Kp), lambda i: (i, 0)),   # one sample's patches
                pl.BlockSpec((Kp, Fp), lambda i: (0, 0)),   # conv weight (resident)
                pl.BlockSpec((1, Fp), lambda i: (0, 0)),    # conv bias
                pl.BlockSpec((1, HW), lambda i: (0, 0)),    # pooling ones-row
                pl.BlockSpec((Fp, NCp), lambda i: (0, 0)),  # fc weight (1/HW folded)
                pl.BlockSpec((1, NCp), lambda i: (0, 0)),   # fc bias
            ],
            out_specs=pl.BlockSpec((1, 1, NCp), lambda i: (i, 0, 0)),
        ),
        compiler_params=pltpu.CompilerParams(
            dimension_semantics=("parallel",)),
        cost_estimate=pl.CostEstimate(
            flops=flops, transcendentals=0, bytes_accessed=bytes_accessed),
    )(patches, wconv, bconv, ones_row, wfc, bfc)

    return out[:, 0, :numclass]


def init_params(key, in_channels, feat_dim, numclass):
    """Deterministic synthetic weights (module shapes from __init__)."""
    k1, k2, k3, k4 = jax.random.split(key, 4)
    w_conv = jax.random.normal(k1, (feat_dim, in_channels, 3, 3),
                               jnp.float32) * 0.1
    b_conv = jax.random.normal(k2, (feat_dim,), jnp.float32) * 0.01
    # self.fc = nn.Linear(feature_extractor.fc.in_features, numclass, bias=True)
    w_fc = jax.random.normal(k3, (numclass, feat_dim), jnp.float32) * 0.1
    b_fc = jax.random.normal(k4, (numclass,), jnp.float32) * 0.01
    # TODO(synk): self.proj (Linear(feat_dim, 128)) is unused in forward(); omitted.
    return {"w_conv": w_conv, "b_conv": b_conv, "w_fc": w_fc, "b_fc": b_fc}


if __name__ == "__main__":
    key = jax.random.PRNGKey(0)
    kx, kp = jax.random.split(key)

    N, C, H, W = 2, 4, 16, 16        # NCHW input, PyTorch convention
    FEAT_DIM = 32                    # feature_extractor.fc.in_features
    NUMCLASS = 10

    x = jax.random.normal(kx, (N, C, H, W), jnp.float32)
    params = init_params(kp, C, FEAT_DIM, NUMCLASS)

    logits = network_forward(x, params)
    jax.block_until_ready(logits)

    assert logits.shape == (N, NUMCLASS)
    assert logits.dtype == jnp.float32
    print("KERNEL_OK")
</pallas_src>

<mosaic_0001>
module attributes {stable_mosaic.version = 11 : i64} {
  func.func @fused_feature_fc_kernel(%arg0: i32, %arg1: memref<256x128xbf16, #tpu.memory_space<vmem>>, %arg2: memref<128x128xbf16, #tpu.memory_space<vmem>>, %arg3: memref<1x128xf32, #tpu.memory_space<vmem>>, %arg4: memref<1x256xf32, #tpu.memory_space<vmem>>, %arg5: memref<128x128xf32, #tpu.memory_space<vmem>>, %arg6: memref<1x128xf32, #tpu.memory_space<vmem>>, %arg7: memref<1x1x128xf32, #tpu.memory_space<vmem>>) attributes {dimension_semantics = [#tpu.dimension_semantics<parallel>], iteration_bounds = array<i64: 2>, scalar_prefetch = 0 : i64, scratch_operands = 0 : i64, tpu.core_type = #tpu.core_type<tc>, window_params = [{transform_indices = @transform_0, window_bounds = array<i64: 256, 128>}, {pipeline_mode = #tpu.pipeline_mode<synchronous>, transform_indices = @transform_1, window_bounds = array<i64: 128, 128>}, {pipeline_mode = #tpu.pipeline_mode<synchronous>, transform_indices = @transform_2, window_bounds = array<i64: 1, 128>}, {pipeline_mode = #tpu.pipeline_mode<synchronous>, transform_indices = @transform_3, window_bounds = array<i64: 1, 256>}, {pipeline_mode = #tpu.pipeline_mode<synchronous>, transform_indices = @transform_4, window_bounds = array<i64: 128, 128>}, {pipeline_mode = #tpu.pipeline_mode<synchronous>, transform_indices = @transform_5, window_bounds = array<i64: 1, 128>}, {transform_indices = @transform_6, window_bounds = array<i64: 1, 1, 128>}]} {
    %c0 = arith.constant 0 : index
    %c0_0 = arith.constant 0 : index
    %0 = vector.load %arg1[%c0, %c0_0] : memref<256x128xbf16, #tpu.memory_space<vmem>>, vector<256x128xbf16>
    %c0_1 = arith.constant 0 : index
    %c0_2 = arith.constant 0 : index
    %1 = vector.load %arg2[%c0_1, %c0_2] : memref<128x128xbf16, #tpu.memory_space<vmem>>, vector<128x128xbf16>
    %cst = arith.constant dense<0.000000e+00> : vector<256x128xf32>
    %2 = tpu.matmul %0, %1, %cst {dimension_numbers = #tpu.dot_dimension_numbers<[1], [0], [0], [1], [0, 0, 1, 1], [], []>} : vector<256x128xbf16>, vector<128x128xbf16>, vector<256x128xf32> -> vector<256x128xf32>
    %c0_3 = arith.constant 0 : index
    %c0_4 = arith.constant 0 : index
    %3 = vector.load %arg3[%c0_3, %c0_4] : memref<1x128xf32, #tpu.memory_space<vmem>>, vector<1x128xf32>
    %4 = vector.broadcast %3 : vector<1x128xf32> to vector<256x128xf32>
    %5 = arith.addf %2, %4 : vector<256x128xf32>
    %cst_5 = arith.constant 0.000000e+00 : f32
    %6 = vector.broadcast %cst_5 : f32 to vector<256x128xf32>
    %7 = arith.maximumf %5, %6 : vector<256x128xf32>
    %c0_6 = arith.constant 0 : index
    %c0_7 = arith.constant 0 : index
    %8 = vector.load %arg4[%c0_6, %c0_7] : memref<1x256xf32, #tpu.memory_space<vmem>>, vector<1x256xf32>
    %cst_8 = arith.constant dense<0.000000e+00> : vector<1x128xf32>
    %9 = tpu.matmul %8, %7, %cst_8 {dimension_numbers = #tpu.dot_dimension_numbers<[1], [0], [0], [1], [0, 0, 1, 1], [], []>} : vector<1x256xf32>, vector<256x128xf32>, vector<1x128xf32> -> vector<1x128xf32>
    %c0_9 = arith.constant 0 : index
    %c0_10 = arith.constant 0 : index
    %10 = vector.load %arg5[%c0_9, %c0_10] : memref<128x128xf32, #tpu.memory_space<vmem>>, vector<128x128xf32>
    %cst_11 = arith.constant dense<0.000000e+00> : vector<1x128xf32>
    %11 = tpu.matmul %9, %10, %cst_11 {dimension_numbers = #tpu.dot_dimension_numbers<[1], [0], [0], [1], [0, 0, 1, 1], [], []>} : vector<1x128xf32>, vector<128x128xf32>, vector<1x128xf32> -> vector<1x128xf32>
    %c0_12 = arith.constant 0 : index
    %c0_13 = arith.constant 0 : index
    %12 = vector.load %arg6[%c0_12, %c0_13] : memref<1x128xf32, #tpu.memory_space<vmem>>, vector<1x128xf32>
    %13 = arith.addf %11, %12 : vector<1x128xf32>
    %14 = vector.shape_cast %13 : vector<1x128xf32> to vector<1x1x128xf32>
    %c0_14 = arith.constant 0 : index
    %c0_15 = arith.constant 0 : index
    %c0_16 = arith.constant 0 : index
    %15 = vector.load %arg7[%c0_14, %c0_15, %c0_16] : memref<1x1x128xf32, #tpu.memory_space<vmem>>, vector<1x1x128xf32>
    tpu.vector_store %arg7[%c0_14, %c0_15, %c0_16], %14 {strides = array<i32>} : memref<1x1x128xf32, #tpu.memory_space<vmem>>, vector<1x1x128xf32>,
    return
  }
  func.func @transform_0(%arg0: i32) -> (i32, i32) {
    %c0_i32 = arith.constant 0 : i32
    %c0_i32_0 = arith.constant 0 : i32
    return %arg0, %c0_i32 : i32, i32
  }
  func.func @transform_1(%arg0: i32) -> (i32, i32) {
    %c0_i32 = arith.constant 0 : i32
    %c0_i32_0 = arith.constant 0 : i32
    %c0_i32_1 = arith.constant 0 : i32
    return %c0_i32, %c0_i32_0 : i32, i32
  }
  func.func @transform_2(%arg0: i32) -> (i32, i32) {
    %c0_i32 = arith.constant 0 : i32
    %c0_i32_0 = arith.constant 0 : i32
    %c0_i32_1 = arith.constant 0 : i32
    return %c0_i32, %c0_i32_0 : i32, i32
  }
  func.func @transform_3(%arg0: i32) -> (i32, i32) {
    %c0_i32 = arith.constant 0 : i32
    %c0_i32_0 = arith.constant 0 : i32
    %c0_i32_1 = arith.constant 0 : i32
    return %c0_i32, %c0_i32_0 : i32, i32
  }
  func.func @transform_4(%arg0: i32) -> (i32, i32) {
    %c0_i32 = arith.constant 0 : i32
    %c0_i32_0 = arith.constant 0 : i32
    %c0_i32_1 = arith.constant 0 : i32
    return %c0_i32, %c0_i32_0 : i32, i32
  }
  func.func @transform_5(%arg0: i32) -> (i32, i32) {
    %c0_i32 = arith.constant 0 : i32
    %c0_i32_0 = arith.constant 0 : i32
    %c0_i32_1 = arith.constant 0 : i32
    return %c0_i32, %c0_i32_0 : i32, i32
  }
  func.func @transform_6(%arg0: i32) -> (i32, i32, i32) {
    %c0_i32 = arith.constant 0 : i32
    %c0_i32_0 = arith.constant 0 : i32
    %c0_i32_1 = arith.constant 0 : i32
    return %arg0, %c0_i32, %c0_i32_0 : i32, i32, i32
  }
}

</mosaic_0001>

<bundles_post_ra>
// kernel: tpu_custom_call.1
= control target key start
LH: loop header
LB: loop body
LE: loop exit
PB: predicated region body
PF: predicated region fallthrough
CT: control target
= control target key end

     0   :  { %11 = vsyncpa [#allocation3], 0  ;;  %s1742_s0 = inlined_call_operand.hbm [shape: bf16[512,128], index: 0, kind: input, shape index: {}]   ;;  %s1743_s1 = inlined_call_operand.hbm [shape: bf16[128,128], index: 1, kind: input, shape index: {}]   ;;  %s1744_s2 = inlined_call_operand.vmem [shape: f32[1,128], index: 2, kind: input, shape index: {}]   ;;  %s1745_s3 = inlined_call_operand.vmem [shape: f32[1,256], index: 3, kind: input, shape index: {}]   ;;  %s1746_s4 = inlined_call_operand.hbm [shape: f32[128,128], index: 4, kind: input, shape index: {}]   ;;  %s1747_s5 = inlined_call_operand.vmem [shape: f32[1,128], index: 5, kind: input, shape index: {}]   ;;  %s1748_s6 = inlined_call_operand.hbm [shape: f32[2,1,128], index: 6, kind: output, shape index: {}]  }
   0x1   :  { %13 = vsyncpa [#allocation3 + $0x1], 0 }
   0x2   :  { %14 = vsyncpa [#allocation6], 0 }
   0x3   :  { %15 = vsyncpa [#allocation4], 0 }
   0x4   :  { %17 = vsyncpa [#allocation4 + $0x1], 0  ;;  %s1452_s21 = smov 0   ;;  %s1454_s22 = smov 0  }
   0x5   :  { %s1456_s23 = smov 0   ;;  %s1458_s24 = smov 0  }
   0x6 LB: > { %s1473_s25 = sadd.s32 4294967295, %s1405_s24   ;;  %s960_s26 = sadd.s32 4294967294, %s1405_s24   ;;  %s1405_s24 = sphi %s1458_s24, %s1773_s24   ;;  %s1401_s23 = sphi %s1456_s23, %s1772_s23   ;;  %s1397_s22 = sphi %s1454_s22, %s1771_s22   ;;  %s1393_s21 = sphi %s1452_s21, %s1770_s21  }
   0x7   : > { %p43_p0 = scmp.ne.s32.totalorder %s1397_s22, %s1393_s21  ;;  %p1749_p1 = scmp.eq.s32.totalorder %s1473_s25, 0 }
   0x8   : > { %p172_p2 = scmp.eq.s32.totalorder %s1473_s25, 1  ;;  %p178_p3 = scmp.eq.s32.totalorder %s960_s26, 1 }
   0x9   : > { %p1482_p4 = por %p1749_p1, %p43_p0  ;;  %p961_p5 = scmp.ge.s32.totalorder %s1405_s24, 1 }
   0xa   : > { %p1487_p6 = por %p178_p3, %p43_p0  ;;  %p185_p7 = scmp.lt.s32.totalorder %s1405_s24, 3 }
   0xb   : > { %s1755_s27 = scalar_select %p1482_p4, 1, 0 }
   0xc   : > { %s1756_s28 = scalar_select %p1487_p6, 1, 0 }
   0xd   : > { %p1492_p8 = pnand %p961_p5, %p185_p7  ;;  %s1407_s30 = smov [#allocation5]  }
   0xe   : > { %s197_s7 = sshll.u32 %s1407_s30, 4  ;;  %s1408_s9 = smov [#allocation7]   ;;  %s198_s7 = int_to_ptr.vmem [resolvable:$true] %s197_s7 }
   0xf   : > { %s1757_s29 = scalar_select %p1492_p8, 1, 0 }
  0x10   : > { %p1172_p9 = pneg %p1492_p8  ;;  %s216_s10 = sshll.u32 %s1408_s9, 4  ;;  %s217_s10 = int_to_ptr.vmem [resolvable:$true] %s216_s10 }
  0x11   : > { %s1268_s11 = scalar_lea.vmem %s198_s7, 1024  ;;  %p1276_p5 = scmp.lt.s32.totalorder %s198_s7, %s198_s7 }
  0x12   : > { %p1501_p11 = pnand %p1172_p9, %p1749_p1  ;;  %p1269_p13 = scmp.ne.s32.totalorder %s198_s7, %s1268_s11 }
  0x13   : > { %p1277_p7 = scmp.lt.s32.totalorder %s1268_s11, %s1268_s11 }
  0x14   : > { %p1259_p12 = pneg %p1501_p11 }
  0x15   : > { %p1278_p10 = por %p1277_p7, %p1276_p5 }
  0x16   : > { %p1271_p0 = pnand %p1269_p13, %p1259_p12 }
  0x18   : > { %p1272_p3 = pneg %p1271_p0 }
  0x1a   : > { %p1279_p9 = pnand %p1278_p10, %p1272_p3 }
  0x1c   : > { %1282 = shalt.err (!%p1279_p9)
}
  0x1d   : > { %s1750_s12 = smov 64   ;;  %s1751_s13 = smov 4  }
  0x1e   : > { %1175 = dma.hbm_to_vmem [thread:$0]  (!%p1501_p11), %s1743_s1, 1024, %s198_s7, [#allocation6], %s1750_s12, %s1750_s12, %s1751_s13  }
  0x1f   : > { %s1294_s16 = scalar_lea.vmem %s217_s10, 2048  ;;  %p1302_p10 = scmp.lt.s32.totalorder %s217_s10, %s217_s10 }
  0x20   : > { %p1295_p13 = scmp.ne.s32.totalorder %s217_s10, %s1294_s16  ;;  %p1303_p3 = scmp.lt.s32.totalorder %s1294_s16, %s1294_s16 }
  0x22   : > { %p1297_p0 = pnand %p1295_p13, %p1259_p12  ;;  %p1304_p7 = por %p1303_p3, %p1302_p10 }
  0x24   : > { %p1298_p5 = pneg %p1297_p0 }
  0x26   : > { %p1305_p9 = pnand %p1304_p7, %p1298_p5 }
  0x28   : > { %1308 = shalt.err (!%p1305_p9)
}
  0x29   : > { %s1411_s17 = smov 128   ;;  %s1412_s18 = smov 8  }
  0x2a   : > { %1178 = dma.hbm_to_vmem [thread:$0]  (!%p1501_p11), %s1746_s4, 2048, %s217_s10, [#allocation6], %s1411_s17, %s1411_s17, %s1412_s18  }
  0x2b   : > { %s1527_s26 = sadd.s32 1, %s1405_s24   ;;  %s30_s7 = sadd.s32 1, %s1401_s23 }
  0x2c   : > { %s27_s30 = ssub.s32 %s1405_s24, %s1527_s26  ;;  %p37_p13 = scmp.ne.s32.totalorder %s1401_s23, %s1397_s22 }
  0x2d   : > { %p28_p12 = scmp.eq.s32.totalorder %s27_s30, 0  ;;  %p38_p0 = scmp.eq.s32.totalorder %s1405_s24, 0 }
  0x2e   : > { %p1540_p10 = por %p172_p2, %p37_p13  ;;  %p1189_p3 = scmp.lt.s32.totalorder %s1405_s24, 2 }
  0x2f   : > { %s1536_s9 = scalar_select %p28_p12, %s1401_s23, %s30_s7  }
  0x30   : > { %p39_p5 = por %p38_p0, %p37_p13  ;;  %s233_s8 = sand.u32 1, %s1401_s23  }
  0x31   : > { %s1759_s11 = scalar_select %p1540_p10, 1, 0 }
  0x32   : > { %s965_s14 = sshll.u32 %s233_s8, 7  ;;  %s1000_s10 = sshll.u32 %s1405_s24, 11 }
  0x33   : > { %s1550_s17 = scalar_lea.hbm %s1742_s0, %s1000_s10  ;;  %s237_s18 = scalar_lea.vmem [#allocation2], %s965_s14 }
  0x34   : > { %s244_s19 = sshll.u32 %s237_s18, 4  ;;  %p1554_p2 = pnand %p1189_p3, %p39_p5  ;;  %s1552_s19 = int_to_ptr.vmem [resolvable:$true] %s244_s19 }
  0x35   : > { %s1558_s30 = scalar_lea.sflag [#allocation3], %s233_s8  ;;  %s1309_s7 = scalar_lea.hbm %s1550_s17, 2048 }
  0x36   : > { %p1310_p11 = scmp.ne.s32.totalorder %s1550_s17, %s1309_s7  ;;  %p1311_p7 = pneg %p1554_p2 }
  0x37   : > { %s1314_s14 = scalar_lea.hbm %s1742_s0, 4096  ;;  %p1315_p13 = scmp.lt.s32.totalorder %s1550_s17, %s1742_s0 }
  0x38   : > { %p1312_p9 = pnand %p1311_p7, %p1310_p11  ;;  %p1316_p0 = scmp.lt.s32.totalorder %s1314_s14, %s1309_s7 }
  0x3a   : > { %p1313_p12 = pneg %p1312_p9  ;;  %p1317_p5 = por %p1316_p0, %p1315_p13 }
  0x3c   : > { %p1318_p3 = pnand %p1317_p5, %p1313_p12 }
  0x3e   : > { %1321 = shalt.err (!%p1318_p3)
}
  0x3f   : > { %s1322_s8 = scalar_lea.vmem %s1552_s19, 2048  ;;  %s1413_s12 = smov [#allocation2]  }
  0x40   : > { %p1323_p1 = scmp.ne.s32.totalorder %s1552_s19, %s1322_s8  ;;  %s1327_s13 = sshll.u32 %s1413_s12, 4  ;;  %s1328_s13 = int_to_ptr.vmem [resolvable:$false] %s1327_s13 }
  0x41   : > { %s1329_s10 = scalar_lea.vmem %s1328_s13, 4096  ;;  %p1330_p9 = scmp.lt.s32.totalorder %s1552_s19, %s1328_s13 }
  0x42   : > { %p1325_p6 = pnand %p1323_p1, %p1311_p7  ;;  %p1331_p10 = scmp.lt.s32.totalorder %s1329_s10, %s1322_s8 }
  0x44   : > { %p1326_p11 = pneg %p1325_p6  ;;  %p1332_p4 = por %p1331_p10, %p1330_p9 }
  0x46   : > { %p1333_p8 = pnand %p1332_p4, %p1326_p11 }
  0x48   : > { %1336 = shalt.err (!%p1333_p8)
}
  0x49   : > { %s1761_s7 = smov 4   ;;  %s1762_s15 = smov 64  }
  0x4a   : > { %1182 = dma.hbm_to_vmem [thread:$0]  (!%p1554_p2), %s1550_s17, 2048, %s1552_s19, %s1558_s30, %s1762_s15, %s1762_s15, %s1761_s7  }
  0x4b   : > { %p1763_p1 = scmp.ne.s32.totalorder %s1757_s29, 0 }
  0x4c   : > { %s1585_s12 = sand.u32 (!%p1763_p1), 1, %s1397_s22   ;;  %p1764_p4 = scmp.ne.s32.totalorder (!%p1763_p1), %s1755_s27, 0 }
  0x4d   : > { %256 = sbr.rel (%p1763_p1) target bundleno = 813 (0x32d), region = 44  ;;  %s969_s13 = sshll.u32 (!%p1763_p1), %s1585_s12, 7 }
  0x4e   : > { %s259_s14 = scalar_lea.sflag (!%p1763_p1), [#allocation3], %s1585_s12  ;;  %s1589_s16 = scalar_lea.vmem (!%p1763_p1), [#allocation2], %s969_s13 }
  0x52   : > { %1380 = dma.done.wait (%p1764_p4), %s259_s14, 2048  }
  0x53   : > { %1382 = vsyncadd (%p1764_p4), %s259_s14, 4294965248  ;;  %p1765_p6 = scmp.eq.s32.totalorder %s1473_s25, 0 }
  0x55   : > { %1384 = dma.done.wait (%p1765_p6), [#allocation6], 3072   ;;  %p1766_p8 = pmov %p1765_p6 }
  0x56   : > { %v1233_v0 = vld [vmem:[#allocation5 + $0x38] sm:$0xff]   ;;  %v1234_v1 = vld [vmem:[#allocation5 + $0x30] sm:$0xff]   ;;  %v1235_v2 = vld [vmem:[#allocation5 + $0x28] sm:$0xff]   ;;  %v694_v24 = vlaneseq  ;;  %vm1415_vm0 = vmmov 0   ;;  %s997_s18 = sshll.u32 %s1473_s25, 4  ;;  %s297_s8 = scalar_lea.vmem [#allocation8], %s1585_s12 }
  0x57   : > { %1386 = vsyncadd (%p1766_p8), [#allocation6], 4294964224  ;;  %1077 = vmatprep.subr.bf16.mxu0 %v1233_v0  ;;  %v1236_v3 = vld [vmem:[#allocation5 + $0x20] sm:$0xff]   ;;  %v1237_v5 = vld [vmem:[#allocation5 + $0x18] sm:$0xff]   ;;  %s875_s10 = sshll.u32 %s297_s8, 4  ;;  %s1705_s13 = scalar_lea.hbm %s1748_s6, %s997_s18  ;;  %s876_s10 = int_to_ptr.vmem [resolvable:$true] %s875_s10 }
  0x58   : > { %1078 = vmatpush3.bf16.msra.mxu0 %v1233_v0  ;;  %v1241_v4 = vld [vmem:[%s1589_s16] sm:$0xff]   ;;  %v1238_v6 = vld [vmem:[#allocation5 + $0x10] sm:$0xff]   ;;  %v1239_v7 = vld [vmem:[#allocation5 + $0x8] sm:$0xff]   ;;  %v695_v25 = vshrl.u32 %v694_v24, 7  ;;  %s863_s14 = scalar_lea.sflag [#allocation4], %s1585_s12  ;;  %p1767_p2 = scmp.ne.s32.totalorder %s1759_s11, 0 }
  0x59   : > { %1079 = vmatprep.subr.bf16.mxu0 %v1234_v1  ;;  %1093 = vmatprep.mubr.bf16.mxu0 %v1241_v4  ;;  %v1240_v8 = vld [vmem:[#allocation5] sm:$0xff]   ;;  %v1242_v9 = vld [vmem:[%s1589_s16 + $0x8] sm:$0xff]   ;;  %v1243_v10 = vld [vmem:[%s1589_s16 + $0x10] sm:$0xff]   ;;  %s1416_s27 = smov [#allocation8]  }
  0x5a   : > { %v1244_v11 = vld [vmem:[%s1589_s16 + $0x18] sm:$0xff]   ;;  %v1245_v12 = vld [vmem:[%s1589_s16 + $0x20] sm:$0xff]   ;;  %v1246_v13 = vld [vmem:[%s1589_s16 + $0x28] sm:$0xff]   ;;  %v700_v26 = vsub.s32 1, %v695_v25  ;;  %v696_v28 = vsub.s32 0, %v695_v25  ;;  %s1341_s25 = sshll.u32 %s1416_s27, 4  ;;  %s1342_s25 = int_to_ptr.vmem [resolvable:$false] %s1341_s25 }
  0x5b   : > { %v1247_v14 = vld [vmem:[%s1589_s16 + $0x30] sm:$0xff]   ;;  %v1248_v15 = vld [vmem:[%s1589_s16 + $0x38] sm:$0xff]   ;;  %v1249_v16 = vld [vmem:[%s1589_s16 + $0x40] sm:$0xff]   ;;  %s1343_s29 = scalar_lea.vmem %s1342_s25, 32  ;;  %p1344_p13 = scmp.lt.s32.totalorder %s876_s10, %s1342_s25 }
  0x5c   : > { %1080 = vmatpush3.bf16.msra.mxu0 %v1234_v1  ;;  %v1250_v17 = vld [vmem:[%s1589_s16 + $0x48] sm:$0xff]   ;;  %v1251_v18 = vld [vmem:[%s1589_s16 + $0x50] sm:$0xff]   ;;  %v1252_v19 = vld [vmem:[%s1589_s16 + $0x58] sm:$0xff]  }
  0x5d   : > { %1081 = vmatprep.subr.bf16.mxu0 %v1235_v2  ;;  %v1253_v20 = vld [vmem:[%s1589_s16 + $0x60] sm:$0xff]   ;;  %v1254_v21 = vld [vmem:[%s1589_s16 + $0x68] sm:$0xff]   ;;  %v1255_v22 = vld [vmem:[%s1589_s16 + $0x70] sm:$0xff]  }
  0x5e   : > { %v1256_v23 = vld [vmem:[%s1589_s16 + $0x78] sm:$0xff]   ;;  %v692_v27 = vld [vmem:[%s1745_s3] sm:$0x3]  ;;  %s1337_s16 = scalar_lea.vmem %s876_s10, 16 }
  0x5f   : > { %v701_v29 = vrot.slane %v692_v27, %v700_v26  ;;  %v1618_v30 = vrot.slane %v692_v27, %v696_v28  ;;  %v1649_v61 = vld [vmem:[%s1744_s2] ss:$0 sm:$0xff]  ;;  %p1338_p10 = scmp.ne.s32.totalorder %s876_s10, %s1337_s16  ;;  %p1345_p0 = scmp.lt.s32.totalorder %s1343_s29, %s1337_s16 }
  0x60   : > { %1082 = vmatpush3.bf16.msra.mxu0 %v1235_v2 }
  0x61   : > { %1083 = vmatprep.subr.bf16.mxu0 %v1236_v3  ;;  %768 = vmatprep.mubr.f32.mxu1 %v701_v29  ;;  %p1339_p7 = pnand %p1338_p10, %p1767_p2  ;;  %p1346_p5 = por %p1345_p0, %p1344_p13 }
  0x63   : > { %p1340_p12 = pneg %p1339_p7 }
  0x64   : > { %1084 = vmatpush3.bf16.msra.mxu0 %v1236_v3 }
  0x65   : > { %1085 = vmatprep.subr.bf16.mxu0 %v1237_v5  ;;  %p1347_p3 = pnand %p1346_p5, %p1340_p12 }
  0x68   : > { %1086 = vmatpush3.bf16.msra.mxu0 %v1237_v5 }
  0x69   : > { %1087 = vmatprep.subr.bf16.mxu0 %v1238_v6 }
  0x6c   : > { %1088 = vmatpush3.bf16.msra.mxu0 %v1238_v6 }
  0x6d   : > { %1089 = vmatprep.subr.bf16.mxu0 %v1239_v7 }
  0x70   : > { %1090 = vmatpush3.bf16.msra.mxu0 %v1239_v7 }
  0x71   : > { %1091 = vmatprep.subr.bf16.mxu0 %v1240_v8 }
  0x74   : > { %1092 = vmatpush3.bf16.msra.mxu0 %v1240_v8 }
  0x77   : > { %1094 = vmatmul.mubr.bf16.vlgmr.msra.gmra.mxu0 %v1242_v9 }
  0x78   : > { %1097 = vmatprep.mubr.bf16.mxu0 %v1243_v10 }
  0x7f   : > { %1098 = vmatmul.mubr.bf16.gmra.mxu0 %v1244_v11 }
  0x80   : > { %1101 = vmatprep.mubr.bf16.mxu0 %v1245_v12 }
  0x87   : > { %1102 = vmatmul.mubr.bf16.gmra.mxu0 %v1246_v13 }
  0x88   : > { %1105 = vmatprep.mubr.bf16.mxu0 %v1247_v14 }
  0x8f   : > { %1106 = vmatmul.mubr.bf16.gmra.mxu0 %v1248_v15 }
  0x90   : > { %1109 = vmatprep.mubr.bf16.mxu0 %v1249_v16 }
  0x97   : > { %1110 = vmatmul.mubr.bf16.gmra.mxu0 %v1250_v17 }
  0x98   : > { %1113 = vmatprep.mubr.bf16.mxu0 %v1251_v18 }
  0x9f   : > { %1114 = vmatmul.mubr.bf16.gmra.mxu0 %v1252_v19 }
  0xa0   : > { %1117 = vmatprep.mubr.bf16.mxu0 %v1253_v20 }
  0xa7   : > { %1118 = vmatmul.mubr.bf16.gmra.mxu0 %v1254_v21 }
  0xa8   : > { %1121 = vmatprep.mubr.bf16.mxu0 %v1255_v22 }
  0xaf   : > { %1122 = vmatmul.mubr.bf16.gmra.mxu0 %v1256_v23 }
 0x137   : > { %v1620_v31 = vpop.f32.mrf.mxu0 }
 0x139   : > { %v1622_v32 = vpop.f32.mrf.mxu0 }
 0x13b   : > { %v1624_v33 = vpop.f32.mrf.mxu0 }
 0x13d   : > { %v1626_v34 = vpop.f32.mrf.mxu0 }
 0x13f   : > { %v1628_v35 = vpop.f32.mrf.mxu0 }
 0x141   : > { %v1630_v36 = vpop.f32.mrf.mxu0 }
 0x143   : > { %v1632_v37 = vpop.f32.mrf.mxu0 }
 0x145   : > { %v1634_v38 = vpop.f32.mrf.mxu0 }
 0x147   : > { %v1103_v39 = vpop.f32.mrf.mxu0 }
 0x148   : > { %v574_v18 = vadd.f32 %v1103_v39, %v1649_v61  ;;  %v561_v39 = vadd.f32 %v1632_v37, %v1649_v61 }
 0x149   : > { %v565_v40 = vpop.f32.mrf.mxu0 }
 0x14a   : > { %v670_v26 = vmax.f32 %v574_v18, 0.0  ;;  %v566_v27 = vadd.f32 %v1649_v61, %v565_v40 }
 0x14b   : > { %v1104_v41 = vpop.f32.mrf.mxu0 }
 0x14c   : > { %v577_v14 = vadd.f32 %v1104_v41, %v1649_v61 }
 0x14d   : > { %v568_v42 = vpop.f32.mrf.mxu0 }
 0x14e   : > { %v671_v22 = vmax.f32 %v577_v14, 0.0  ;;  %v569_v23 = vadd.f32 %v1649_v61, %v568_v42  ;;  %v776_v14 = vld [vmem:[#allocation7 + $0x10] sm:$0xff] }
 0x14f   : > { %v1107_v43 = vpop.f32.mrf.mxu0 }
 0x150   : > { %v590_v2 = vadd.f32 %v1107_v43, %v1649_v61  ;;  %v669_v41 = vmax.f32 %v569_v23, 0.0 }
 0x151   : > { %v581_v44 = vpop.f32.mrf.mxu0 }
 0x152   : > { %v674_v10 = vmax.f32 %v590_v2, 0.0  ;;  %v582_v11 = vadd.f32 %v1649_v61, %v581_v44  ;;  %v558_v44 = vadd.f32 %v1628_v35, %v1649_v61  ;;  %v550_v35 = vadd.f32 %v1649_v61, %v1630_v36 }
 0x153   : > { %v1108_v45 = vpop.f32.mrf.mxu0 }
 0x154   : > { %v593_v62 = vadd.f32 %v1108_v45, %v1649_v61  ;;  %v672_v19 = vmax.f32 %v582_v11, 0.0  ;;  %v668_v45 = vmax.f32 %v566_v27, 0.0  ;;  %v664_v36 = vmax.f32 %v550_v35, 0.0  ;;  %v779_v11 = vld [vmem:[#allocation7 + $0x28] sm:$0xff] }
 0x155   : > { %v584_v46 = vpop.f32.mrf.mxu0 }
 0x156   : > { %v675_v6 = vmax.f32 %v593_v62, 0.0  ;;  %v585_v7 = vadd.f32 %v1649_v61, %v584_v46 }
 0x157   : > { %v1636_v47 = vpop.f32.mrf.mxu0 }
 0x158   : > { %v673_v15 = vmax.f32 %v585_v7, 0.0  ;;  %v784_v7 = vld [vmem:[#allocation7 + $0x50] sm:$0xff] }
 0x159   : > { %v1638_v48 = vpop.f32.mrf.mxu0 }
 0x15b   : > { %v1640_v49 = vpop.f32.mrf.mxu0 }
 0x15d   : > { %v1642_v50 = vpop.f32.mrf.mxu0 }
 0x15f   : > { %v1115_v51 = vpop.f32.mrf.mxu0 }
 0x160   : > { %v622_v42 = vadd.f32 %v1115_v51, %v1649_v61 }
 0x161   : > { %v1644_v52 = vpop.f32.mrf.mxu0 }
 0x162   : > { %v682_v37 = vmax.f32 %v622_v42, 0.0  ;;  %v614_v51 = vadd.f32 %v1649_v61, %v1644_v52 }
 0x163   : > { %v1116_v53 = vpop.f32.mrf.mxu0 }
 0x164   : > { %v625_v28 = vadd.f32 %v1116_v53, %v1649_v61  ;;  %v667_v53 = vmax.f32 %v561_v39, 0.0  ;;  %v680_v52 = vmax.f32 %v614_v51, 0.0 }
 0x165   : > { %v616_v54 = vpop.f32.mrf.mxu0 }
 0x166   : > { %v683_v40 = vmax.f32 %v625_v28, 0.0  ;;  %v617_v46 = vadd.f32 %v1649_v61, %v616_v54 }
 0x167   : > { %v1119_v55 = vpop.f32.mrf.mxu0 }
 0x168   : > { %v638_v16 = vadd.f32 %v1119_v55, %v1649_v61  ;;  %v553_v55 = vadd.f32 %v1649_v61, %v1634_v38  ;;  %v681_v54 = vmax.f32 %v617_v46, 0.0 }
 0x169   : > { %v629_v56 = vpop.f32.mrf.mxu0 }
 0x16a   : > { %v686_v24 = vmax.f32 %v638_v16, 0.0  ;;  %v630_v25 = vadd.f32 %v1649_v61, %v629_v56  ;;  %v666_v56 = vmax.f32 %v558_v44, 0.0  ;;  %v665_v38 = vmax.f32 %v553_v55, 0.0  ;;  %v774_v16 = vld [vmem:[#allocation7] sm:$0xff] }
 0x16b   : > { %v1120_v57 = vpop.f32.mrf.mxu0 }
 0x16c   : > { %v641_v12 = vadd.f32 %v1120_v57, %v1649_v61  ;;  %v684_v43 = vmax.f32 %v630_v25, 0.0  ;;  %v609_v57 = vadd.f32 %v1640_v49, %v1649_v61  ;;  %v601_v49 = vadd.f32 %v1649_v61, %v1642_v50 }
 0x16d   : > { %v632_v58 = vpop.f32.mrf.mxu0 }
 0x16e   : > { %v687_v20 = vmax.f32 %v641_v12, 0.0  ;;  %v633_v21 = vadd.f32 %v1649_v61, %v632_v58  ;;  %v545_v58 = vadd.f32 %v1624_v33, %v1649_v61  ;;  %v679_v62 = vmax.f32 %v609_v57, 0.0  ;;  %v778_v12 = vld [vmem:[#allocation7 + $0x20] sm:$0xff] }
 0x16f   : > { %v1123_v59 = vpop.f32.mrf.mxu0  ;;  %v537_v33 = vadd.f32 %v1649_v61, %v1626_v34  ;;  %v677_v2 = vmax.f32 %v601_v49, 0.0  ;;  %v789_v34 = vld [vmem:[#allocation7 + $0x78] sm:$0xff] }
 0x170   : > { %v654_v0 = vadd.f32 %v1123_v59, %v1649_v61  ;;  %v685_v29 = vmax.f32 %v633_v21, 0.0  ;;  %v606_v59 = vadd.f32 %v1636_v47, %v1649_v61  ;;  %v598_v47 = vadd.f32 %v1649_v61, %v1638_v48 }
 0x171   : > { %v645_v60 = vpop.f32.mrf.mxu0  ;;  %v1414_v48 = vmov 0.0  }
 0x172   : > { %v690_v8 = vmax.f32 %v654_v0, 0.0  ;;  %v646_v9 = vadd.f32 %v1649_v61, %v645_v60  ;;  %v542_v60 = vadd.f32 %v1620_v31, %v1649_v61  ;;  %v678_v0 = vmax.f32 %v606_v59, 0.0 }
 0x173   : > { %v1124_v63 = vpop.f32.mrf.mxu0  ;;  %v534_v31 = vadd.f32 %v1649_v61, %v1622_v32  ;;  %v676_v50 = vmax.f32 %v598_v47, 0.0  ;;  %v787_v32 = vld [vmem:[#allocation7 + $0x68] sm:$0xff] }
 0x174   : > { %v657_v1 = vadd.f32 %v1124_v63, %v1649_v61  ;;  %v688_v17 = vmax.f32 %v646_v9, 0.0  ;;  %v663_v63 = vmax.f32 %v545_v58, 0.0  ;;  %v781_v9 = vld [vmem:[#allocation7 + $0x38] sm:$0xff] }
 0x175   : > { %v648_v3 = vpop.f32.mrf.mxu0 }
 0x176   : > { %v649_v4 = vadd.f32 %v1649_v61, %v648_v3  ;;  %v691_v5 = vmax.f32 %v657_v1, 0.0  ;;  %v662_v1 = vmax.f32 %v542_v60, 0.0  ;;  %v661_v3 = vmax.f32 %v537_v33, 0.0  ;;  %v786_v61 = vld [vmem:[#allocation7 + $0x60] sm:$0xff] }
 0x178   : > { %1025 = vmatprep.subr.mxu1 %v691_v5  ;;  %v689_v13 = vmax.f32 %v649_v4, 0.0  ;;  %v660_v4 = vmax.f32 %v534_v31, 0.0  ;;  %v788_v5 = vld [vmem:[#allocation7 + $0x70] sm:$0xff] }
 0x179   : > { %1026 = vmatpush3.msra.mxu1 %v675_v6  ;;  %v785_v6 = vld [vmem:[#allocation7 + $0x58] sm:$0xff] }
 0x17a   : > { %1027 = vmatprep.subr.mxu1 %v690_v8  ;;  %v783_v8 = vld [vmem:[#allocation7 + $0x48] sm:$0xff] }
 0x17b   : > { %1028 = vmatpush3.msra.mxu1 %v674_v10  ;;  %v780_v10 = vld [vmem:[#allocation7 + $0x30] sm:$0xff] }
 0x17c   : > { %1029 = vmatprep.subr.mxu1 %v689_v13  ;;  %v777_v13 = vld [vmem:[#allocation7 + $0x18] sm:$0xff] }
 0x17d   : > { %1030 = vmatpush3.msra.mxu1 %v673_v15  ;;  %v775_v15 = vld [vmem:[#allocation7 + $0x8] sm:$0xff] }
 0x17e   : > { %1031 = vmatprep.subr.mxu1 %v688_v17 }
 0x17f   : > { %1032 = vmatpush3.msra.mxu1 %v672_v19 }
 0x180   : > { %1033 = vmatprep.subr.mxu1 %v687_v20  ;;  %v790_v20 = vld [vmem:[%s1747_s5] sm:$0x1] }
 0x181   : > { %1034 = vmatpush3.msra.mxu1 %v671_v22 }
 0x182   : > { %1035 = vmatprep.subr.mxu1 %v686_v24 }
 0x183   : > { %1036 = vmatpush3.msra.mxu1 %v670_v26 }
 0x184   : > { %1037 = vmatprep.subr.mxu1 %v685_v29 }
 0x185   : > { %1038 = vmatpush3.msra.mxu1 %v669_v41 }
 0x186   : > { %1039 = vmatprep.subr.mxu1 %v684_v43 }
 0x187   : > { %1040 = vmatpush3.msra.mxu1 %v668_v45 }
 0x188   : > { %1041 = vmatprep.subr.mxu1 %v683_v40 }
 0x189   : > { %1042 = vmatpush3.msra.mxu1 %v667_v53 }
 0x18a   : > { %1043 = vmatprep.subr.mxu1 %v682_v37 }
 0x18b   : > { %1044 = vmatpush3.msra.mxu1 %v666_v56 }
 0x18c   : > { %1045 = vmatprep.subr.mxu1 %v681_v54 }
 0x18d   : > { %1046 = vmatpush3.msra.mxu1 %v665_v38 }
 0x18e   : > { %1047 = vmatprep.subr.mxu1 %v680_v52 }
 0x18f   : > { %1048 = vmatpush3.msra.mxu1 %v664_v36 }
 0x190   : > { %1049 = vmatprep.subr.mxu1 %v679_v62 }
 0x191   : > { %1050 = vmatpush3.msra.mxu1 %v663_v63 }
 0x192   : > { %1051 = vmatprep.subr.mxu1 %v678_v0 }
 0x193   : > { %1052 = vmatpush3.msra.mxu1 %v662_v1 }
 0x194   : > { %1053 = vmatprep.subr.mxu1 %v677_v2 }
 0x195   : > { %1054 = vmatpush3.msra.mxu1 %v661_v3 }
 0x196   : > { %1055 = vmatprep.subr.mxu1 %v676_v50 }
 0x197   : > { %1056 = vmatpush3.msra.mxu1 %v660_v4 }
 0x198   : > { %769 = vmatmul.mubr.f32.vlgmr.msra.gmra.mxu1 %v1618_v30  ;;  %1125 = vmatprep.subr.mxu1 %v1414_v48  ;;  %v782_v30 = vld [vmem:[#allocation7 + $0x40] sm:$0xff] }
 0x199   : > { %1126 = vmatpush3.msra.mxu1 %v789_v34  ;;  %1157 = vmatprep.mubr.msk.f32.mxu1 %vm1415_vm0, %v1414_v48 }
 0x19a   : > { %1127 = vmatprep.subr.mxu1 %v1414_v48 }
 0x19b   : > { %1128 = vmatpush3.msra.mxu1 %v788_v5 }
 0x19c   : > { %1129 = vmatprep.subr.mxu1 %v1414_v48 }
 0x19d   : > { %1130 = vmatpush3.msra.mxu1 %v787_v32 }
 0x19e   : > { %1131 = vmatprep.subr.mxu1 %v1414_v48 }
 0x19f   : > { %1132 = vmatpush3.msra.mxu1 %v786_v61 }
 0x1a0   : > { %1133 = vmatprep.subr.mxu1 %v1414_v48 }
 0x1a1   : > { %1134 = vmatpush3.msra.mxu1 %v785_v6 }
 0x1a2   : > { %1135 = vmatprep.subr.mxu1 %v1414_v48 }
 0x1a3   : > { %1136 = vmatpush3.msra.mxu1 %v784_v7 }
 0x1a4   : > { %1137 = vmatprep.subr.mxu1 %v1414_v48 }
 0x1a5   : > { %1138 = vmatpush3.msra.mxu1 %v783_v8 }
 0x1a6   : > { %1139 = vmatprep.subr.mxu1 %v1414_v48 }
 0x1a7   : > { %1140 = vmatpush3.msra.mxu1 %v782_v30 }
 0x1a8   : > { %1141 = vmatprep.subr.mxu1 %v1414_v48 }
 0x1a9   : > { %1142 = vmatpush3.msra.mxu1 %v781_v9 }
 0x1aa   : > { %1143 = vmatprep.subr.mxu1 %v1414_v48 }
 0x1ab   : > { %1144 = vmatpush3.msra.mxu1 %v780_v10 }
 0x1ac   : > { %1145 = vmatprep.subr.mxu1 %v1414_v48 }
 0x1ad   : > { %1146 = vmatpush3.msra.mxu1 %v779_v11 }
 0x1ae   : > { %1147 = vmatprep.subr.mxu1 %v1414_v48 }
 0x1af   : > { %1148 = vmatpush3.msra.mxu1 %v778_v12 }
 0x1b0   : > { %1149 = vmatprep.subr.mxu1 %v1414_v48 }
 0x1b1   : > { %1150 = vmatpush3.msra.mxu1 %v777_v13 }
 0x1b2   : > { %1151 = vmatprep.subr.mxu1 %v1414_v48 }
 0x1b3   : > { %1152 = vmatpush3.msra.mxu1 %v776_v14 }
 0x1b4   : > { %1153 = vmatprep.subr.mxu1 %v1414_v48 }
 0x1b5   : > { %1154 = vmatpush3.msra.mxu1 %v775_v15 }
 0x1b6   : > { %1155 = vmatprep.subr.mxu1 %v1414_v48 }
 0x1b7   : > { %1156 = vmatpush3.msra.mxu1 %v774_v16 }
 0x258   : > { %v1057_v17 = vpop.f32.mrf.mxu1 }
 0x25a   : > { %v1058_v18 = vpop.f32.mrf.mxu1 }
 0x25b   : > { %v1059_v19 = vadd.f32 %v1058_v18, %v1057_v17 }
 0x25d   : > { %1158 = vmatmul.mubr.f32.vlgmr.msra.gmra.mxu1 %v1059_v19 }
 0x31d   : > { %v857_v21 = vpop.f32.mrf.mxu1 }
 0x31e   : > { %v858_v22 = vadd.f32 %v857_v21, %v790_v20 }
 0x31f   : > { %v1159_v23 = vpop.f32.mrf.mxu1 }
 0x320   : > { %861 = vst [vmem:[%s297_s8] sm:$0x1] %v858_v22 }
 0x321   : > { %1350 = shalt.err (!%p1347_p3)
}
 0x322   : > { %s1351_s17 = scalar_lea.hbm %s1705_s13, 16  ;;  %s1355_s20 = scalar_lea.hbm %s1748_s6, 32 }
 0x323   : > { %p1352_p11 = scmp.ne.s32.totalorder %s1705_s13, %s1351_s17  ;;  %p1356_p4 = scmp.lt.s32.totalorder %s1705_s13, %s1748_s6 }
 0x324   : > { %p1357_p6 = scmp.lt.s32.totalorder %s1355_s20, %s1351_s17 }
 0x325   : > { %p1353_p9 = pnand %p1352_p11, %p1767_p2 }
 0x326   : > { %p1358_p8 = por %p1357_p6, %p1356_p4 }
 0x327   : > { %p1354_p1 = pneg %p1353_p9 }
 0x329   : > { %p1359_p10 = pnand %p1358_p8, %p1354_p1 }
 0x32b   : > { %1362 = shalt.err (!%p1359_p10)
}
 0x32c   : > { %1170 = dma.vmem_to_hbm [thread:$0]  (%p1767_p2), %s876_s10, 16, %s1705_s13, %s863_s14  }
 0x32d PF: > { %s887_s8 = sand.u32 1, %s1393_s21   ;;  %p1768_p7 = scmp.ne.s32.totalorder %s1756_s28, 0 }
 0x32e   : > { %p1769_p12 = scmp.ge.s32.totalorder %s1405_s24, 2  ;;  %s888_s7 = scalar_lea.sflag [#allocation4], %s887_s8 }
 0x330   : > { %p1184_p13 = pnand %p1769_p12, %p1768_p7 }
 0x332   : > { %p1185_p0 = pneg %p1184_p13 }
 0x334   : > { %1388 = dma.done.wait (%p1185_p0), %s888_s7, 16  }
 0x335   : > { %1390 = vsyncadd (%p1185_p0), %s888_s7, 4294967280  ;;  %p20_p5 = scmp.ge.s32.totalorder %s1527_s26, 4   ;;  %s1770_s21 = smov %s1397_s22 }
 0x336   : > { %s1771_s22 = smov %s1401_s23  ;;  %s1772_s23 = smov %s1536_s9 }
 0x337   : > { %s1773_s24 = smov %s1527_s26  ;;  %22 = sbr.rel (!%p20_p5) target bundleno = 6 (0x6), region = 97 }
 0x33c   :  { %892 = vsyncpa [#allocation3], 1 }
 0x33d   :  { %894 = vsyncpa [#allocation3 + $0x1], 1 }
 0x33e   :  { %895 = vsyncpa [#allocation6], 1 }
 0x33f   :  { %896 = vsyncpa [#allocation4], 1 }
 0x340   :  { %898 = vsyncpa [#allocation4 + $0x1], 1 }

</bundles_post_ra>
